<compile_context>
chip_gen: v7x
topology: tpu7x:2x2x1
jax: 0.10.0
libtpu: 0.0.40
codegen_flags: <defaults>
</compile_context>

<pallas_src>
import jax
import jax.numpy as jnp
from jax.experimental import pallas as pl
from jax.experimental.pallas import tpu as pltpu


def _round_up(x, m):
    return ((x + m - 1) // m) * m


def _ceil_div(a, b):
    return -(-a // b)


_MAX_TM = 2048  # rows per M-tile; double-buffered VMEM here is ~0.7 KiB/row


def _min_grid_tiles():
    """Chips with 2 TensorCores per Pallas device want a grid of >= 2."""
    try:
        kind = jax.devices()[0].device_kind.lower()
    except Exception:
        return 1
    return 2 if any(t in kind for t in ("v7", "v4", "v5p")) else 1


def _choose_m_tiling(m, min_tiles):
    """Return (Mp, tm): padded row count and M-tile size (tm multiple of 8)."""
    n_tiles = max(min_tiles, _ceil_div(m, _MAX_TM))
    tm = _round_up(_ceil_div(m, n_tiles), 8)
    return tm * n_tiles, tm


# --------------------------------------------------------------------------
# Fused Pallas kernel: backbone matmul + bias + ReLU + combined-head matmul
# --------------------------------------------------------------------------
def _fused_detector_kernel(p_ref, w1_ref, b1_ref, wh_ref, bh_ref, o_ref):
    """One M-tile of the detector hot path.

    p  : (TM, Kp)  bf16   im2col patches (Kp = 48, real K = 36)
    w1 : (Kp, Hp)  bf16   backbone 3x3-conv weights (resident)
    b1 : (1,  Hp)  f32    backbone bias
    wh : (Hp, Np)  bf16   [cls | box] head weights concatenated (resident)
    bh : (1,  Np)  f32    [cls | box] head bias concatenated
    o  : (TM, Np)  bf16   lane-dense combined head output slab
    """
    # Backbone: bf16 MXU matmul, f32 accumulation, f32 bias+ReLU epilogue.
    feat = jnp.dot(p_ref[...], w1_ref[...], preferred_element_type=jnp.float32)
    feat = jnp.maximum(feat + b1_ref[...], 0.0)
    # Heads: single fused MXU matmul over concatenated [cls|box] weights.
    # `feat` never leaves on-chip memory.
    out = jnp.dot(feat.astype(jnp.bfloat16), wh_ref[...],
                  preferred_element_type=jnp.float32)
    # f32 bias add, then store a bf16 slab (halves the HBM write).
    o_ref[...] = (out + bh_ref[...]).astype(jnp.bfloat16)


def fused_detector_forward(patches, w1, b1, wh, bh, *, tm):
    """patches:(Mp,Kp) bf16, weights pre-padded; returns (Mp, Np) bf16 slab."""
    Mp, Kp = patches.shape
    Hp = w1.shape[1]
    Np = wh.shape[1]
    assert Mp % tm == 0
    return pl.pallas_call(
        _fused_detector_kernel,
        out_shape=jax.ShapeDtypeStruct((Mp, Np), jnp.bfloat16),
        grid_spec=pltpu.PrefetchScalarGridSpec(
            num_scalar_prefetch=0,
            grid=(Mp // tm,),
            in_specs=[
                pl.BlockSpec((tm, Kp), lambda i: (i, 0)),   # M-tiled activations
                pl.BlockSpec((Kp, Hp), lambda i: (0, 0)),   # weights stay resident
                pl.BlockSpec((1, Hp), lambda i: (0, 0)),
                pl.BlockSpec((Hp, Np), lambda i: (0, 0)),
                pl.BlockSpec((1, Np), lambda i: (0, 0)),
            ],
            out_specs=pl.BlockSpec((tm, Np), lambda i: (i, 0)),
        ),
        compiler_params=pltpu.CompilerParams(
            # Independent M-tiles -> shard the grid across TensorCores on
            # megacore chips (v4 / v5p / v7x); harmless on v5e / v6e.
            dimension_semantics=("parallel",),
        ),
    )(patches, w1, b1, wh, bh)


# --------------------------------------------------------------------------
# Glue: im2col (pure reshuffling, stays in plain JAX / XLA)
# --------------------------------------------------------------------------
def im2col_3x3(x_nhwc):
    """x:(N,H,W,C) -> patches:(N*H*W, 9*C), 'same' padding, (ky,kx,C) order."""
    n, h, w, c = x_nhwc.shape
    xp = jnp.pad(x_nhwc, ((0, 0), (1, 1), (1, 1), (0, 0)))
    cols = [
        xp[:, dy: dy + h, dx: dx + w, :] for dy in range(3) for dx in range(3)
    ]
    patches = jnp.concatenate(cols, axis=-1)  # (N,H,W,9*C)
    return patches.reshape(n * h * w, 9 * c)


# --------------------------------------------------------------------------
# Synthetic inner detection model + the meta wrapper
# --------------------------------------------------------------------------
class TinyDetector:
    """3x3 conv (pad=1) + ReLU backbone, 1x1 conv cls / box heads."""

    def __init__(self, key, in_ch=4, hidden=32, num_classes=3, num_anchors=3):
        self.in_ch = in_ch
        self.hidden = hidden
        self.num_classes = num_classes
        self.num_anchors = num_anchors

        K = 9 * in_ch                       # im2col width (36)
        n_cls = num_anchors * num_classes   # 9
        n_box = num_anchors * 4             # 12
        self.K, self.n_cls, self.n_box = K, n_cls, n_box
        # Padded operand shapes (padded ONCE at init):
        #   Kp only to a multiple of 16 (bf16 sublane packing) -> 48, NOT 128:
        #   cuts activation HBM reads ~2.7x vs lane-padding K to 128.
        #   Hp / Np stay at 128 (lane-dense MXU tiles / output slab).
        self.Kp = _round_up(K, 16)                # 48
        self.Hp = _round_up(hidden, 128)          # 128
        self.Np = _round_up(n_cls + n_box, 128)   # 128

        k1, k2, k3, k4, k5, k6 = jax.random.split(key, 6)
        w1 = 0.1 * jax.random.normal(k1, (K, hidden), jnp.float32)
        b1 = 0.1 * jax.random.normal(k2, (hidden,), jnp.float32)
        wc = 0.1 * jax.random.normal(k3, (hidden, n_cls), jnp.float32)
        bc = 0.1 * jax.random.normal(k4, (n_cls,), jnp.float32)
        wb = 0.1 * jax.random.normal(k5, (hidden, n_box), jnp.float32)
        bb = 0.1 * jax.random.normal(k6, (n_box,), jnp.float32)

        # Keep f32 originals for the reference path / correctness check.
        self.w1_f32, self.b1_f32 = w1, b1
        self.wc_f32, self.bc_f32 = wc, bc
        self.wb_f32, self.bb_f32 = wb, bb

        # Pre-padded bf16 matmul operands, f32 biases (f32 epilogue in-kernel).
        self.w1_p = (
            jnp.zeros((self.Kp, self.Hp), jnp.bfloat16)
            .at[:K, :hidden].set(w1.astype(jnp.bfloat16))
        )
        self.b1_p = jnp.zeros((1, self.Hp), jnp.float32).at[0, :hidden].set(b1)

        wh = jnp.concatenate([wc, wb], axis=1)            # (hidden, 21)
        bh = jnp.concatenate([bc, bb], axis=0)            # (21,)
        self.wh_p = (
            jnp.zeros((self.Hp, self.Np), jnp.bfloat16)
            .at[:hidden, : n_cls + n_box].set(wh.astype(jnp.bfloat16))
        )
        self.bh_p = (
            jnp.zeros((1, self.Np), jnp.float32).at[0, : n_cls + n_box].set(bh)
        )

    def __call__(self, images_nchw, targets=None):
        n, c, h, w = images_nchw.shape
        assert c == self.in_ch
        # NCHW -> NHWC, cast once to bf16 (halves HBM traffic into im2col).
        x_nhwc = jnp.transpose(images_nchw, (0, 2, 3, 1)).astype(jnp.bfloat16)

        patches = im2col_3x3(x_nhwc)                       # (M, 36) bf16
        M = patches.shape[0]

        # Tile choice: biggest tiles that fit (cap 2048 rows); keep grid >= 2
        # on dual-TensorCore chips so ("parallel",) feeds both cores, collapse
        # to the fewest tiles on single-TC chips (v5e / v6e).
        Mp, tm = _choose_m_tiling(M, _min_grid_tiles())
        patches = jnp.pad(
            patches, ((0, Mp - M), (0, self.Kp - patches.shape[1]))
        )

        # Single fused Pallas kernel: backbone + both heads -> bf16 slab.
        out = fused_detector_forward(
            patches, self.w1_p, self.b1_p, self.wh_p, self.bh_p, tm=tm
        )

        # Slice the real rows / columns FIRST (bf16), so the padded slab is
        # never re-read by the reshape / transpose glue.
        out = out[:M, : self.n_cls + self.n_box]           # (M, 21) bf16
        cls_flat = out[:, : self.n_cls]
        box_flat = out[:, self.n_cls:]

        cls_nchw = jnp.transpose(
            cls_flat.reshape(n, h, w, self.n_cls), (0, 3, 1, 2)
        ).astype(jnp.float32)
        box_nchw = jnp.transpose(
            box_flat.reshape(n, h, w, self.n_box), (0, 3, 1, 2)
        ).astype(jnp.float32)

        # TODO(synk): training-mode detection losses (matcher / target
        # assignment) have no clean Pallas equivalent here; targets is ignored.
        return {"cls_logits": cls_nchw, "bbox_regression": box_nchw}

    # Pure-JAX f32 reference (for correctness checks only).
    def reference(self, images_nchw):
        n, c, h, w = images_nchw.shape
        x_nhwc = jnp.transpose(images_nchw, (0, 2, 3, 1)).astype(jnp.float32)
        patches = im2col_3x3(x_nhwc)                                  # (M, 36)
        feat = jnp.maximum(patches @ self.w1_f32 + self.b1_f32, 0.0)  # (M, hid)
        cls_flat = feat @ self.wc_f32 + self.bc_f32
        box_flat = feat @ self.wb_f32 + self.bb_f32
        cls_nchw = jnp.transpose(
            cls_flat.reshape(n, h, w, self.n_cls), (0, 3, 1, 2))
        box_nchw = jnp.transpose(
            box_flat.reshape(n, h, w, self.n_box), (0, 3, 1, 2))
        return {"cls_logits": cls_nchw, "bbox_regression": box_nchw}


class MetaDetectionWrapper:
    """Exact semantics of the PyTorch wrapper: pure pass-through."""

    def __init__(self, model):
        self.model = model

    def __call__(self, images, targets=None):
        return self.model(images, targets)


# --------------------------------------------------------------------------
if __name__ == "__main__":
    key = jax.random.PRNGKey(0)
    k_model, k_img = jax.random.split(key)

    model = TinyDetector(k_model, in_ch=4, hidden=32, num_classes=3, num_anchors=3)
    wrapper = MetaDetectionWrapper(model)

    # small NCHW detection input: batch=2, channels=4, spatial=16x16
    images = jax.random.normal(k_img, (2, 4, 16, 16), jnp.float32)

    fwd = jax.jit(lambda imgs: wrapper(imgs, None))
    out = fwd(images)
    jax.block_until_ready(out)

    assert out["cls_logits"].shape == (2, 9, 16, 16)
    assert out["bbox_regression"].shape == (2, 12, 16, 16)
    assert bool(jnp.all(jnp.isfinite(out["cls_logits"])))
    assert bool(jnp.all(jnp.isfinite(out["bbox_regression"])))

    # Correctness vs the pure-JAX f32 reference (bf16 matmul operands =>
    # loose tolerance).
    ref = model.reference(images)
    for k in ("cls_logits", "bbox_regression"):
        err = float(jnp.max(jnp.abs(out[k] - ref[k])))
        assert err < 0.1, f"{k} max abs err {err}"

    print("KERNEL_OK")
</pallas_src>

<mosaic_0001>
module attributes {stable_mosaic.version = 11 : i64} {
  func.func @_fused_detector_kernel(%arg0: i32, %arg1: memref<512x48xbf16, #tpu.memory_space<vmem>>, %arg2: memref<48x128xbf16, #tpu.memory_space<vmem>>, %arg3: memref<1x128xf32, #tpu.memory_space<vmem>>, %arg4: memref<128x128xbf16, #tpu.memory_space<vmem>>, %arg5: memref<1x128xf32, #tpu.memory_space<vmem>>, %arg6: memref<512x128xbf16, #tpu.memory_space<vmem>>) attributes {dimension_semantics = [#tpu.dimension_semantics<parallel>], iteration_bounds = array<i64: 1>, scalar_prefetch = 0 : i64, scratch_operands = 0 : i64, tpu.core_type = #tpu.core_type<tc>, window_params = [{transform_indices = @transform_0, window_bounds = array<i64: 512, 48>}, {pipeline_mode = #tpu.pipeline_mode<synchronous>, transform_indices = @transform_1, window_bounds = array<i64: 48, 128>}, {pipeline_mode = #tpu.pipeline_mode<synchronous>, transform_indices = @transform_2, window_bounds = array<i64: 1, 128>}, {pipeline_mode = #tpu.pipeline_mode<synchronous>, transform_indices = @transform_3, window_bounds = array<i64: 128, 128>}, {pipeline_mode = #tpu.pipeline_mode<synchronous>, transform_indices = @transform_4, window_bounds = array<i64: 1, 128>}, {transform_indices = @transform_5, window_bounds = array<i64: 512, 128>}]} {
    %c0 = arith.constant 0 : index
    %c0_0 = arith.constant 0 : index
    %0 = vector.load %arg1[%c0, %c0_0] : memref<512x48xbf16, #tpu.memory_space<vmem>>, vector<512x48xbf16>
    %c0_1 = arith.constant 0 : index
    %c0_2 = arith.constant 0 : index
    %1 = vector.load %arg2[%c0_1, %c0_2] : memref<48x128xbf16, #tpu.memory_space<vmem>>, vector<48x128xbf16>
    %cst = arith.constant dense<0.000000e+00> : vector<512x128xf32>
    %2 = tpu.matmul %0, %1, %cst {dimension_numbers = #tpu.dot_dimension_numbers<[1], [0], [0], [1], [0, 0, 1, 1], [], []>} : vector<512x48xbf16>, vector<48x128xbf16>, vector<512x128xf32> -> vector<512x128xf32>
    %c0_3 = arith.constant 0 : index
    %c0_4 = arith.constant 0 : index
    %3 = vector.load %arg3[%c0_3, %c0_4] : memref<1x128xf32, #tpu.memory_space<vmem>>, vector<1x128xf32>
    %4 = vector.broadcast %3 : vector<1x128xf32> to vector<512x128xf32>
    %5 = arith.addf %2, %4 : vector<512x128xf32>
    %cst_5 = arith.constant 0.000000e+00 : f32
    %6 = vector.broadcast %cst_5 : f32 to vector<512x128xf32>
    %7 = arith.maximumf %5, %6 : vector<512x128xf32>
    %8 = arith.truncf %7 : vector<512x128xf32> to vector<512x128xbf16>
    %c0_6 = arith.constant 0 : index
    %c0_7 = arith.constant 0 : index
    %9 = vector.load %arg4[%c0_6, %c0_7] : memref<128x128xbf16, #tpu.memory_space<vmem>>, vector<128x128xbf16>
    %cst_8 = arith.constant dense<0.000000e+00> : vector<512x128xf32>
    %10 = tpu.matmul %8, %9, %cst_8 {dimension_numbers = #tpu.dot_dimension_numbers<[1], [0], [0], [1], [0, 0, 1, 1], [], []>} : vector<512x128xbf16>, vector<128x128xbf16>, vector<512x128xf32> -> vector<512x128xf32>
    %c0_9 = arith.constant 0 : index
    %c0_10 = arith.constant 0 : index
    %11 = vector.load %arg5[%c0_9, %c0_10] : memref<1x128xf32, #tpu.memory_space<vmem>>, vector<1x128xf32>
    %12 = vector.broadcast %11 : vector<1x128xf32> to vector<512x128xf32>
    %13 = arith.addf %10, %12 : vector<512x128xf32>
    %14 = arith.truncf %13 : vector<512x128xf32> to vector<512x128xbf16>
    %c0_11 = arith.constant 0 : index
    %c0_12 = arith.constant 0 : index
    %15 = vector.load %arg6[%c0_11, %c0_12] : memref<512x128xbf16, #tpu.memory_space<vmem>>, vector<512x128xbf16>
    tpu.vector_store %arg6[%c0_11, %c0_12], %14 {strides = array<i32>} : memref<512x128xbf16, #tpu.memory_space<vmem>>, vector<512x128xbf16>,
    return
  }
  func.func @transform_0(%arg0: i32) -> (i32, i32) {
    %c0_i32 = arith.constant 0 : i32
    %c0_i32_0 = arith.constant 0 : i32
    return %arg0, %c0_i32 : i32, i32
  }
  func.func @transform_1(%arg0: i32) -> (i32, i32) {
    %c0_i32 = arith.constant 0 : i32
    %c0_i32_0 = arith.constant 0 : i32
    %c0_i32_1 = arith.constant 0 : i32
    return %c0_i32, %c0_i32_0 : i32, i32
  }
  func.func @transform_2(%arg0: i32) -> (i32, i32) {
    %c0_i32 = arith.constant 0 : i32
    %c0_i32_0 = arith.constant 0 : i32
    %c0_i32_1 = arith.constant 0 : i32
    return %c0_i32, %c0_i32_0 : i32, i32
  }
  func.func @transform_3(%arg0: i32) -> (i32, i32) {
    %c0_i32 = arith.constant 0 : i32
    %c0_i32_0 = arith.constant 0 : i32
    %c0_i32_1 = arith.constant 0 : i32
    return %c0_i32, %c0_i32_0 : i32, i32
  }
  func.func @transform_4(%arg0: i32) -> (i32, i32) {
    %c0_i32 = arith.constant 0 : i32
    %c0_i32_0 = arith.constant 0 : i32
    %c0_i32_1 = arith.constant 0 : i32
    return %c0_i32, %c0_i32_0 : i32, i32
  }
  func.func @transform_5(%arg0: i32) -> (i32, i32) {
    %c0_i32 = arith.constant 0 : i32
    %c0_i32_0 = arith.constant 0 : i32
    return %arg0, %c0_i32 : i32, i32
  }
}

</mosaic_0001>

<bundles_post_ra>
// kernel: _lambda_.1
= control target key start
LH: loop header
LB: loop body
LE: loop exit
PB: predicated region body
PF: predicated region fallthrough
CT: control target
= control target key end

     0   :  { %vm276_vm0 = vcmask 392192   ;;  %s2547_s1 = inlined_call_operand.vmem [shape: bf16[48,128], index: 1, kind: input, shape index: {}]   ;;  %s2548_s0 = inlined_call_operand.vmem [shape: bf16[512,48], index: 0, kind: input, shape index: {}]   ;;  %s2549_s3 = inlined_call_operand.vmem [shape: bf16[128,128], index: 3, kind: input, shape index: {}]   ;;  %s2550_s2 = inlined_call_operand.vmem [shape: f32[1,128], index: 2, kind: input, shape index: {}]   ;;  %s2551_s4 = inlined_call_operand.vmem [shape: f32[1,128], index: 4, kind: input, shape index: {}]   ;;  %s2552_s5 = inlined_call_operand.vmem [shape: bf16[512,128], index: 5, kind: output, shape index: {}]  }
   0x1   :  { %v2079_v0 = vld [vmem:[%s2547_s1] sm:$0xff]   ;;  %v2080_v1 = vld [vmem:[%s2547_s1 + $0x8] sm:$0xff]   ;;  %v2081_v3 = vld [vmem:[%s2547_s1 + $0x10] sm:$0xff]  }
   0x2   :  { %1913 = vmatprep.subr.bf16.mxu0 %v2079_v0  ;;  %v2082_v2 = vld [vmem:[%s2548_s0] sm:$0xff]   ;;  %v2083_v4 = vld [vmem:[%s2548_s0 + $0x8] sm:$0xff]   ;;  %v2084_v5 = vld [vmem:[%s2548_s0 + $0x10] sm:$0xff]  }
   0x3   :  { %1914 = vmatpush3.bf16.msra.mxu0 %v2079_v0  ;;  %1919 = vmatprep.mubr.msk.bf16.mxu0 %vm276_vm0, %v2082_v2  ;;  %v2085_v6 = vld [vmem:[%s2548_s0 + $0x18] sm:$0xff]   ;;  %v2086_v7 = vld [vmem:[%s2548_s0 + $0x20] sm:$0xff]   ;;  %v2087_v8 = vld [vmem:[%s2548_s0 + $0x28] sm:$0xff]  }
   0x4   :  { %1915 = vmatprep.subr.bf16.mxu0 %v2080_v1  ;;  %v2088_v9 = vld [vmem:[%s2548_s0 + $0x30] sm:$0xff]   ;;  %v2089_v10 = vld [vmem:[%s2548_s0 + $0x38] sm:$0xff]   ;;  %v2090_v11 = vld [vmem:[%s2548_s0 + $0x40] sm:$0xff]  }
   0x5   :  { %v2114_v12 = vld [vmem:[%s2549_s3] sm:$0xff]   ;;  %v2115_v13 = vld [vmem:[%s2549_s3 + $0x8] sm:$0xff]   ;;  %v2116_v14 = vld [vmem:[%s2549_s3 + $0x10] sm:$0xff]  }
   0x6   :  { %2063 = vmatprep.subr.bf16.mxu1 %v2114_v12  ;;  %v2091_v15 = vld [vmem:[%s2548_s0 + $0x48] sm:$0xff]   ;;  %v2092_v16 = vld [vmem:[%s2548_s0 + $0x50] sm:$0xff]   ;;  %v2117_v17 = vld [vmem:[%s2549_s3 + $0x18] sm:$0xff]  }
   0x7   :  { %1916 = vmatpush3.bf16.msra.mxu0 %v2080_v1  ;;  %2071 = vmatpush3.bf16.msra.mxu1 %v2114_v12  ;;  %v2118_v18 = vld [vmem:[%s2549_s3 + $0x20] sm:$0xff]   ;;  %v2093_v19 = vld [vmem:[%s2548_s0 + $0x58] sm:$0xff]   ;;  %v2119_v21 = vld [vmem:[%s2549_s3 + $0x28] sm:$0xff]  }
   0x8   :  { %1917 = vmatprep.subr.bf16.mxu0 %v2081_v3  ;;  %2064 = vmatprep.subr.bf16.mxu1 %v2115_v13  ;;  %v2094_v20 = vld [vmem:[%s2548_s0 + $0x60] sm:$0xff]   ;;  %v2095_v22 = vld [vmem:[%s2548_s0 + $0x68] sm:$0xff]   ;;  %v2096_v23 = vld [vmem:[%s2548_s0 + $0x70] sm:$0xff]  }
   0x9   :  { %v2097_v24 = vld [vmem:[%s2548_s0 + $0x78] sm:$0xff]   ;;  %v2098_v25 = vld [vmem:[%s2548_s0 + $0x80] sm:$0xff]   ;;  %v2099_v26 = vld [vmem:[%s2548_s0 + $0x88] sm:$0xff]  }
   0xa   :  { %v2100_v27 = vld [vmem:[%s2548_s0 + $0x90] sm:$0xff]   ;;  %v2101_v28 = vld [vmem:[%s2548_s0 + $0x98] sm:$0xff]   ;;  %v2102_v29 = vld [vmem:[%s2548_s0 + $0xa0] sm:$0xff]  }
   0xb   :  { %1918 = vmatpush3.bf16.msra.mxu0 %v2081_v3  ;;  %2072 = vmatpush3.bf16.msra.mxu1 %v2115_v13  ;;  %v2103_v30 = vld [vmem:[%s2548_s0 + $0xa8] sm:$0xff]   ;;  %v2104_v31 = vld [vmem:[%s2548_s0 + $0xb0] sm:$0xff]   ;;  %v2105_v32 = vld [vmem:[%s2548_s0 + $0xb8] sm:$0xff]  }
   0xc   :  { %1983 = vmatprep.subr.bf16.mxu0 %v2114_v12  ;;  %2065 = vmatprep.subr.bf16.mxu1 %v2116_v14  ;;  %v2120_v33 = vld [vmem:[%s2549_s3 + $0x30] sm:$0xff]   ;;  %v2106_v34 = vld [vmem:[%s2548_s0 + $0xc0] sm:$0xff]   ;;  %v2121_v35 = vld [vmem:[%s2549_s3 + $0x38] sm:$0xff]  }
   0xd   :  { %v2107_v36 = vld [vmem:[%s2548_s0 + $0xc8] sm:$0xff]   ;;  %v2108_v37 = vld [vmem:[%s2548_s0 + $0xd0] sm:$0xff]   ;;  %v2109_v38 = vld [vmem:[%s2548_s0 + $0xd8] sm:$0xff]  }
   0xe   :  { %1920 = vmatmul.mubr.msk.bf16.vlgmr.msra.gmra.mrb[0].mxu0 %vm276_vm0, %v2083_v4  ;;  %v2110_v39 = vld [vmem:[%s2548_s0 + $0xe0] sm:$0xff]   ;;  %v2111_v40 = vld [vmem:[%s2548_s0 + $0xe8] sm:$0xff]   ;;  %v2112_v41 = vld [vmem:[%s2548_s0 + $0xf0] sm:$0xff]  }
   0xf   :  { %1923 = vmatprep.mubr.msk.bf16.mxu0 %vm276_vm0, %v2084_v5  ;;  %1984 = vmatpush3.bf16.msra.mxu0 %v2114_v12  ;;  %v2113_v42 = vld [vmem:[%s2548_s0 + $0xf8] sm:$0xff]   ;;  %v2316_v43 = vld [vmem:[%s2550_s2] ss:$0 sm:$0xff] }
  0x10   :  { %1985 = vmatprep.subr.bf16.mxu0 %v2115_v13  ;;  %2073 = vmatpush3.bf16.msra.mxu1 %v2116_v14 }
  0x11   :  { %2066 = vmatprep.subr.bf16.mxu1 %v2117_v17 }
  0x13   :  { %1986 = vmatpush3.bf16.msra.mxu0 %v2115_v13 }
  0x14   :  { %1987 = vmatprep.subr.bf16.mxu0 %v2116_v14  ;;  %2074 = vmatpush3.bf16.msra.mxu1 %v2117_v17 }
  0x15   :  { %2067 = vmatprep.subr.bf16.mxu1 %v2118_v18 }
  0x16   :  { %1924 = vmatmul.mubr.msk.bf16.gmra.mrb[4].mxu0 %vm276_vm0, %v2085_v6 }
  0x17   :  { %1927 = vmatprep.mubr.msk.bf16.mxu0 %vm276_vm0, %v2086_v7  ;;  %1988 = vmatpush3.bf16.msra.mxu0 %v2116_v14 }
  0x18   :  { %1989 = vmatprep.subr.bf16.mxu0 %v2117_v17  ;;  %2075 = vmatpush3.bf16.msra.mxu1 %v2118_v18 }
  0x19   :  { %2068 = vmatprep.subr.bf16.mxu1 %v2119_v21 }
  0x1b   :  { %1990 = vmatpush3.bf16.msra.mxu0 %v2117_v17 }
  0x1c   :  { %1991 = vmatprep.subr.bf16.mxu0 %v2118_v18  ;;  %2076 = vmatpush3.bf16.msra.mxu1 %v2119_v21 }
  0x1d   :  { %2069 = vmatprep.subr.bf16.mxu1 %v2120_v33 }
  0x1e   :  { %1928 = vmatmul.mubr.msk.bf16.gmra.mrb[8].mxu0 %vm276_vm0, %v2087_v8 }
  0x1f   :  { %1931 = vmatprep.mubr.msk.bf16.mxu0 %vm276_vm0, %v2088_v9  ;;  %1992 = vmatpush3.bf16.msra.mxu0 %v2118_v18 }
  0x20   :  { %1993 = vmatprep.subr.bf16.mxu0 %v2119_v21  ;;  %2077 = vmatpush3.bf16.msra.mxu1 %v2120_v33 }
  0x21   :  { %2070 = vmatprep.subr.bf16.mxu1 %v2121_v35 }
  0x23   :  { %1994 = vmatpush3.bf16.msra.mxu0 %v2119_v21 }
  0x24   :  { %1995 = vmatprep.subr.bf16.mxu0 %v2120_v33  ;;  %2078 = vmatpush3.bf16.msra.mxu1 %v2121_v35 }
  0x26   :  { %1932 = vmatmul.mubr.msk.bf16.gmra.mrb[12].mxu0 %vm276_vm0, %v2089_v10 }
  0x27   :  { %1935 = vmatprep.mubr.msk.bf16.mxu0 %vm276_vm0, %v2090_v11  ;;  %1996 = vmatpush3.bf16.msra.mxu0 %v2120_v33 }
  0x28   :  { %1997 = vmatprep.subr.bf16.mxu0 %v2121_v35 }
  0x2b   :  { %1998 = vmatpush3.bf16.msra.mxu0 %v2121_v35 }
  0x2e   :  { %1936 = vmatmul.mubr.msk.bf16.gmra.mrb[16].mxu0 %vm276_vm0, %v2091_v15 }
  0x2f   :  { %1939 = vmatprep.mubr.msk.bf16.mxu0 %vm276_vm0, %v2092_v16 }
  0x36   :  { %1940 = vmatmul.mubr.msk.bf16.gmra.mrb[20].mxu0 %vm276_vm0, %v2093_v19 }
  0x37   :  { %1943 = vmatprep.mubr.msk.bf16.mxu0 %vm276_vm0, %v2094_v20 }
  0x3e   :  { %1944 = vmatmul.mubr.msk.bf16.gmra.mrb[24].mxu0 %vm276_vm0, %v2095_v22 }
  0x3f   :  { %1947 = vmatprep.mubr.msk.bf16.mxu0 %vm276_vm0, %v2096_v23 }
  0x46   :  { %1948 = vmatmul.mubr.msk.bf16.gmra.mrb[28].mxu0 %vm276_vm0, %v2097_v24 }
  0x47   :  { %1951 = vmatprep.mubr.msk.bf16.mxu0 %vm276_vm0, %v2098_v25 }
  0x4e   :  { %1952 = vmatmul.mubr.msk.bf16.gmra.mrb[32].mxu0 %vm276_vm0, %v2099_v26 }
  0x4f   :  { %1955 = vmatprep.mubr.msk.bf16.mxu0 %vm276_vm0, %v2100_v27 }
  0x56   :  { %1956 = vmatmul.mubr.msk.bf16.gmra.mrb[36].mxu0 %vm276_vm0, %v2101_v28 }
  0x57   :  { %1959 = vmatprep.mubr.msk.bf16.mxu0 %vm276_vm0, %v2102_v29 }
  0x5e   :  { %1960 = vmatmul.mubr.msk.bf16.gmra.mrb[40].mxu0 %vm276_vm0, %v2103_v30 }
  0x5f   :  { %1963 = vmatprep.mubr.msk.bf16.mxu0 %vm276_vm0, %v2104_v31 }
  0x66   :  { %1964 = vmatmul.mubr.msk.bf16.gmra.mrb[44].mxu0 %vm276_vm0, %v2105_v32 }
  0x67   :  { %1967 = vmatprep.mubr.msk.bf16.mxu0 %vm276_vm0, %v2106_v34 }
  0x6e   :  { %1968 = vmatmul.mubr.msk.bf16.gmra.mrb[48].mxu0 %vm276_vm0, %v2107_v36 }
  0x6f   :  { %1971 = vmatprep.mubr.msk.bf16.mxu0 %vm276_vm0, %v2108_v37 }
  0x76   :  { %1972 = vmatmul.mubr.msk.bf16.gmra.mrb[52].mxu0 %vm276_vm0, %v2109_v38 }
  0x77   :  { %1975 = vmatprep.mubr.msk.bf16.mxu0 %vm276_vm0, %v2110_v39 }
  0x7e   :  { %1976 = vmatmul.mubr.msk.bf16.gmra.mrb[56].mxu0 %vm276_vm0, %v2111_v40 }
  0x7f   :  { %1979 = vmatprep.mubr.msk.bf16.mxu0 %vm276_vm0, %v2112_v41 }
  0x86   :  { %1980 = vmatmul.mubr.msk.bf16.gmra.mrb[60].mxu0 %vm276_vm0, %v2113_v42 }
  0xe1   :  { %v1921_v44 = vpop.f32.mrb[0].mxu0 }
  0xe2   :  { %v416_v45 = vadd.f32 %v1921_v44, %v2316_v43  ;;  %v407_v46 = vpop.f32.mrb[1].mxu0 }
  0xe3   :  { %v408_v47 = vadd.f32 %v2316_v43, %v407_v46  ;;  %v1922_v48 = vpop.f32.mrb[2].mxu0 }
  0xe4   :  { %v419_v49 = vadd.f32 %v1922_v48, %v2316_v43  ;;  %v410_v50 = vpop.f32.mrb[3].mxu0  ;;  %v664_v52 = vmax.f32 %v416_v45, 0.0 }
  0xe5   :  { %v411_v51 = vadd.f32 %v2316_v43, %v410_v50  ;;  %v662_v54 = vmax.f32 %v408_v47, 0.0 }
  0xe6   :  { %v665_v53 = vmax.f32 %v419_v49, 0.0 }
  0xe7   :  { %v663_v55 = vmax.f32 %v411_v51, 0.0 }
  0xe8   :  { %v727_v56 = vpack.c.bf16 %v665_v53, %v664_v52 }
  0xe9   :  { %v726_v57 = vpack.c.bf16 %v663_v55, %v662_v54  ;;  %v1925_v58 = vpop.f32.mrb[4].mxu0 }
  0xea   :  { %v432_v59 = vadd.f32 %v1925_v58, %v2316_v43  ;;  %v423_v60 = vpop.f32.mrb[5].mxu0 }
  0xeb   :  { %v424_v61 = vadd.f32 %v2316_v43, %v423_v60  ;;  %v1926_v62 = vpop.f32.mrb[6].mxu0  ;;  %1999 = vmatprep.mubr.bf16.mxu0 %v726_v57 }
  0xec   :  { %v435_v63 = vadd.f32 %v1926_v62, %v2316_v43  ;;  %v426_v0 = vpop.f32.mrb[7].mxu0  ;;  %2000 = vmatmul.mubr.bf16.vlgmr.msra.gmra.mrb[64].mxu0 %v727_v56  ;;  %v668_v2 = vmax.f32 %v432_v59, 0.0 }
  0xed   :  { %v427_v1 = vadd.f32 %v2316_v43, %v426_v0  ;;  %v666_v4 = vmax.f32 %v424_v61, 0.0 }
  0xee   :  { %v669_v3 = vmax.f32 %v435_v63, 0.0 }
  0xef   :  { %v667_v5 = vmax.f32 %v427_v1, 0.0 }
  0xf0   :  { %v729_v6 = vpack.c.bf16 %v669_v3, %v668_v2 }
  0xf1   :  { %v1929_v7 = vpop.f32.mrb[8].mxu0  ;;  %v728_v8 = vpack.c.bf16 %v667_v5, %v666_v4 }
  0xf2   :  { %v448_v9 = vadd.f32 %v1929_v7, %v2316_v43  ;;  %v439_v10 = vpop.f32.mrb[9].mxu0 }
  0xf3   :  { %v440_v11 = vadd.f32 %v2316_v43, %v439_v10  ;;  %v1930_v12 = vpop.f32.mrb[10].mxu0  ;;  %2003 = vmatprep.mubr.bf16.mxu1 %v728_v8 }
  0xf4   :  { %v451_v13 = vadd.f32 %v1930_v12, %v2316_v43  ;;  %v442_v14 = vpop.f32.mrb[11].mxu0  ;;  %2004 = vmatmul.mubr.bf16.vlgmr.msra.gmra.mrb[0].mxu1 %v729_v6  ;;  %v672_v16 = vmax.f32 %v448_v9, 0.0 }
  0xf5   :  { %v443_v15 = vadd.f32 %v2316_v43, %v442_v14  ;;  %v670_v18 = vmax.f32 %v440_v11, 0.0 }
  0xf6   :  { %v673_v17 = vmax.f32 %v451_v13, 0.0 }
  0xf7   :  { %v671_v19 = vmax.f32 %v443_v15, 0.0 }
  0xf8   :  { %v731_v20 = vpack.c.bf16 %v673_v17, %v672_v16 }
  0xf9   :  { %v730_v21 = vpack.c.bf16 %v671_v19, %v670_v18  ;;  %v1933_v22 = vpop.f32.mrb[12].mxu0 }
  0xfa   :  { %v464_v23 = vadd.f32 %v1933_v22, %v2316_v43  ;;  %v455_v24 = vpop.f32.mrb[13].mxu0 }
  0xfb   :  { %v456_v25 = vadd.f32 %v2316_v43, %v455_v24  ;;  %v1934_v26 = vpop.f32.mrb[14].mxu0  ;;  %2007 = vmatprep.mubr.bf16.mxu1 %v730_v21 }
  0xfc   :  { %v467_v27 = vadd.f32 %v1934_v26, %v2316_v43  ;;  %v458_v28 = vpop.f32.mrb[15].mxu0  ;;  %2008 = vmatmul.mubr.bf16.gmra.mrb[4].mxu1 %v731_v20  ;;  %v676_v30 = vmax.f32 %v464_v23, 0.0 }
  0xfd   :  { %v459_v29 = vadd.f32 %v2316_v43, %v458_v28  ;;  %v674_v32 = vmax.f32 %v456_v25, 0.0 }
  0xfe   :  { %v677_v31 = vmax.f32 %v467_v27, 0.0 }
  0xff   :  { %v675_v33 = vmax.f32 %v459_v29, 0.0 }
 0x100   :  { %v733_v34 = vpack.c.bf16 %v677_v31, %v676_v30 }
 0x101   :  { %v732_v35 = vpack.c.bf16 %v675_v33, %v674_v32  ;;  %v1937_v36 = vpop.f32.mrb[16].mxu0 }
 0x102   :  { %v480_v37 = vadd.f32 %v1937_v36, %v2316_v43  ;;  %v471_v38 = vpop.f32.mrb[17].mxu0 }
 0x103   :  { %v472_v39 = vadd.f32 %v2316_v43, %v471_v38  ;;  %v1938_v40 = vpop.f32.mrb[18].mxu0  ;;  %2011 = vmatprep.mubr.bf16.mxu1 %v732_v35 }
 0x104   :  { %v483_v41 = vadd.f32 %v1938_v40, %v2316_v43  ;;  %v474_v42 = vpop.f32.mrb[19].mxu0  ;;  %2012 = vmatmul.mubr.bf16.gmra.mrb[8].mxu1 %v733_v34  ;;  %v680_v45 = vmax.f32 %v480_v37, 0.0 }
 0x105   :  { %v475_v44 = vadd.f32 %v2316_v43, %v474_v42  ;;  %v678_v47 = vmax.f32 %v472_v39, 0.0 }
 0x106   :  { %v681_v46 = vmax.f32 %v483_v41, 0.0 }
 0x107   :  { %v679_v48 = vmax.f32 %v475_v44, 0.0 }
 0x108   :  { %v735_v49 = vpack.c.bf16 %v681_v46, %v680_v45 }
 0x109   :  { %v734_v50 = vpack.c.bf16 %v679_v48, %v678_v47  ;;  %v1941_v51 = vpop.f32.mrb[20].mxu0 }
 0x10a   :  { %v496_v52 = vadd.f32 %v1941_v51, %v2316_v43  ;;  %v487_v53 = vpop.f32.mrb[21].mxu0 }
 0x10b   :  { %v488_v54 = vadd.f32 %v2316_v43, %v487_v53  ;;  %v1942_v55 = vpop.f32.mrb[22].mxu0  ;;  %2015 = vmatprep.mubr.bf16.mxu1 %v734_v50 }
 0x10c   :  { %v499_v56 = vadd.f32 %v1942_v55, %v2316_v43  ;;  %v490_v57 = vpop.f32.mrb[23].mxu0  ;;  %2016 = vmatmul.mubr.bf16.gmra.mrb[12].mxu1 %v735_v49  ;;  %v684_v59 = vmax.f32 %v496_v52, 0.0 }
 0x10d   :  { %v491_v58 = vadd.f32 %v2316_v43, %v490_v57  ;;  %v682_v61 = vmax.f32 %v488_v54, 0.0 }
 0x10e   :  { %v685_v60 = vmax.f32 %v499_v56, 0.0 }
 0x10f   :  { %v683_v62 = vmax.f32 %v491_v58, 0.0 }
 0x110   :  { %v737_v63 = vpack.c.bf16 %v685_v60, %v684_v59 }
 0x111   :  { %v736_v0 = vpack.c.bf16 %v683_v62, %v682_v61  ;;  %v1945_v1 = vpop.f32.mrb[24].mxu0 }
 0x112   :  { %v512_v2 = vadd.f32 %v1945_v1, %v2316_v43  ;;  %v503_v3 = vpop.f32.mrb[25].mxu0 }
 0x113   :  { %v504_v4 = vadd.f32 %v2316_v43, %v503_v3  ;;  %v1946_v5 = vpop.f32.mrb[26].mxu0  ;;  %2019 = vmatprep.mubr.bf16.mxu1 %v736_v0 }
 0x114   :  { %v515_v6 = vadd.f32 %v1946_v5, %v2316_v43  ;;  %v506_v7 = vpop.f32.mrb[27].mxu0  ;;  %2020 = vmatmul.mubr.bf16.gmra.mrb[16].mxu1 %v737_v63  ;;  %v688_v9 = vmax.f32 %v512_v2, 0.0 }
 0x115   :  { %v507_v8 = vadd.f32 %v2316_v43, %v506_v7  ;;  %v686_v11 = vmax.f32 %v504_v4, 0.0 }
 0x116   :  { %v689_v10 = vmax.f32 %v515_v6, 0.0 }
 0x117   :  { %v687_v12 = vmax.f32 %v507_v8, 0.0 }
 0x118   :  { %v739_v13 = vpack.c.bf16 %v689_v10, %v688_v9 }
 0x119   :  { %v738_v14 = vpack.c.bf16 %v687_v12, %v686_v11  ;;  %v1949_v15 = vpop.f32.mrb[28].mxu0 }
 0x11a   :  { %v528_v16 = vadd.f32 %v1949_v15, %v2316_v43  ;;  %v519_v17 = vpop.f32.mrb[29].mxu0 }
 0x11b   :  { %v520_v18 = vadd.f32 %v2316_v43, %v519_v17  ;;  %v1950_v19 = vpop.f32.mrb[30].mxu0  ;;  %2023 = vmatprep.mubr.bf16.mxu1 %v738_v14 }
 0x11c   :  { %v531_v20 = vadd.f32 %v1950_v19, %v2316_v43  ;;  %v522_v21 = vpop.f32.mrb[31].mxu0  ;;  %2024 = vmatmul.mubr.bf16.gmra.mrb[20].mxu1 %v739_v13  ;;  %v692_v23 = vmax.f32 %v528_v16, 0.0 }
 0x11d   :  { %v523_v22 = vadd.f32 %v2316_v43, %v522_v21  ;;  %v690_v25 = vmax.f32 %v520_v18, 0.0 }
 0x11e   :  { %v693_v24 = vmax.f32 %v531_v20, 0.0 }
 0x11f   :  { %v691_v26 = vmax.f32 %v523_v22, 0.0 }
 0x120   :  { %v741_v27 = vpack.c.bf16 %v693_v24, %v692_v23 }
 0x121   :  { %v740_v28 = vpack.c.bf16 %v691_v26, %v690_v25  ;;  %v1953_v29 = vpop.f32.mrb[32].mxu0 }
 0x122   :  { %v544_v30 = vadd.f32 %v1953_v29, %v2316_v43  ;;  %v535_v31 = vpop.f32.mrb[33].mxu0 }
 0x123   :  { %v536_v32 = vadd.f32 %v2316_v43, %v535_v31  ;;  %v1954_v33 = vpop.f32.mrb[34].mxu0  ;;  %2027 = vmatprep.mubr.bf16.mxu1 %v740_v28 }
 0x124   :  { %v547_v34 = vadd.f32 %v1954_v33, %v2316_v43  ;;  %v538_v35 = vpop.f32.mrb[35].mxu0  ;;  %2028 = vmatmul.mubr.bf16.gmra.mrb[24].mxu1 %v741_v27  ;;  %v696_v37 = vmax.f32 %v544_v30, 0.0 }
 0x125   :  { %v539_v36 = vadd.f32 %v2316_v43, %v538_v35  ;;  %v694_v39 = vmax.f32 %v536_v32, 0.0 }
 0x126   :  { %v697_v38 = vmax.f32 %v547_v34, 0.0 }
 0x127   :  { %v695_v40 = vmax.f32 %v539_v36, 0.0 }
 0x128   :  { %v743_v41 = vpack.c.bf16 %v697_v38, %v696_v37 }
 0x129   :  { %v742_v42 = vpack.c.bf16 %v695_v40, %v694_v39  ;;  %v1957_v44 = vpop.f32.mrb[36].mxu0 }
 0x12a   :  { %v560_v45 = vadd.f32 %v1957_v44, %v2316_v43  ;;  %v551_v46 = vpop.f32.mrb[37].mxu0 }
 0x12b   :  { %v552_v47 = vadd.f32 %v2316_v43, %v551_v46  ;;  %v1958_v48 = vpop.f32.mrb[38].mxu0  ;;  %2031 = vmatprep.mubr.bf16.mxu1 %v742_v42 }
 0x12c   :  { %v563_v49 = vadd.f32 %v1958_v48, %v2316_v43  ;;  %v554_v50 = vpop.f32.mrb[39].mxu0  ;;  %2032 = vmatmul.mubr.bf16.gmra.mrb[28].mxu1 %v743_v41  ;;  %v700_v52 = vmax.f32 %v560_v45, 0.0 }
 0x12d   :  { %v555_v51 = vadd.f32 %v2316_v43, %v554_v50  ;;  %v698_v54 = vmax.f32 %v552_v47, 0.0 }
 0x12e   :  { %v701_v53 = vmax.f32 %v563_v49, 0.0 }
 0x12f   :  { %v699_v55 = vmax.f32 %v555_v51, 0.0 }
 0x130   :  { %v745_v56 = vpack.c.bf16 %v701_v53, %v700_v52 }
 0x131   :  { %v744_v57 = vpack.c.bf16 %v699_v55, %v698_v54  ;;  %v1961_v58 = vpop.f32.mrb[40].mxu0 }
 0x132   :  { %v576_v59 = vadd.f32 %v1961_v58, %v2316_v43  ;;  %v567_v60 = vpop.f32.mrb[41].mxu0 }
 0x133   :  { %v568_v61 = vadd.f32 %v2316_v43, %v567_v60  ;;  %v1962_v62 = vpop.f32.mrb[42].mxu0  ;;  %2035 = vmatprep.mubr.bf16.mxu1 %v744_v57 }
 0x134   :  { %v579_v63 = vadd.f32 %v1962_v62, %v2316_v43  ;;  %v570_v0 = vpop.f32.mrb[43].mxu0  ;;  %2036 = vmatmul.mubr.bf16.gmra.mrb[32].mxu1 %v745_v56  ;;  %v704_v2 = vmax.f32 %v576_v59, 0.0 }
 0x135   :  { %v571_v1 = vadd.f32 %v2316_v43, %v570_v0  ;;  %v702_v4 = vmax.f32 %v568_v61, 0.0 }
 0x136   :  { %v705_v3 = vmax.f32 %v579_v63, 0.0 }
 0x137   :  { %v703_v5 = vmax.f32 %v571_v1, 0.0 }
 0x138   :  { %v747_v6 = vpack.c.bf16 %v705_v3, %v704_v2 }
 0x139   :  { %v746_v7 = vpack.c.bf16 %v703_v5, %v702_v4  ;;  %v1965_v8 = vpop.f32.mrb[44].mxu0 }
 0x13a   :  { %v592_v9 = vadd.f32 %v1965_v8, %v2316_v43  ;;  %v583_v10 = vpop.f32.mrb[45].mxu0 }
 0x13b   :  { %v584_v11 = vadd.f32 %v2316_v43, %v583_v10  ;;  %v1966_v12 = vpop.f32.mrb[46].mxu0  ;;  %2039 = vmatprep.mubr.bf16.mxu1 %v746_v7 }
 0x13c   :  { %v595_v13 = vadd.f32 %v1966_v12, %v2316_v43  ;;  %v586_v14 = vpop.f32.mrb[47].mxu0  ;;  %2040 = vmatmul.mubr.bf16.gmra.mrb[36].mxu1 %v747_v6  ;;  %v708_v16 = vmax.f32 %v592_v9, 0.0 }
 0x13d   :  { %v587_v15 = vadd.f32 %v2316_v43, %v586_v14  ;;  %v706_v18 = vmax.f32 %v584_v11, 0.0 }
 0x13e   :  { %v709_v17 = vmax.f32 %v595_v13, 0.0 }
 0x13f   :  { %v707_v19 = vmax.f32 %v587_v15, 0.0 }
 0x140   :  { %v749_v20 = vpack.c.bf16 %v709_v17, %v708_v16  ;;  %v2385_v16 = vld [vmem:[%s2551_s4] ss:$0 sm:$0xff] }
 0x141   :  { %v748_v21 = vpack.c.bf16 %v707_v19, %v706_v18  ;;  %v1969_v22 = vpop.f32.mrb[48].mxu0 }
 0x142   :  { %v608_v23 = vadd.f32 %v1969_v22, %v2316_v43  ;;  %v599_v24 = vpop.f32.mrb[49].mxu0 }
 0x143   :  { %v600_v25 = vadd.f32 %v2316_v43, %v599_v24  ;;  %v1970_v26 = vpop.f32.mrb[50].mxu0  ;;  %2043 = vmatprep.mubr.bf16.mxu1 %v748_v21 }
 0x144   :  { %v611_v27 = vadd.f32 %v1970_v26, %v2316_v43  ;;  %v602_v28 = vpop.f32.mrb[51].mxu0  ;;  %2044 = vmatmul.mubr.bf16.gmra.mrb[40].mxu1 %v749_v20  ;;  %v712_v30 = vmax.f32 %v608_v23, 0.0 }
 0x145   :  { %v603_v29 = vadd.f32 %v2316_v43, %v602_v28  ;;  %v710_v32 = vmax.f32 %v600_v25, 0.0 }
 0x146   :  { %v713_v31 = vmax.f32 %v611_v27, 0.0 }
 0x147   :  { %v711_v33 = vmax.f32 %v603_v29, 0.0 }
 0x148   :  { %v751_v34 = vpack.c.bf16 %v713_v31, %v712_v30 }
 0x149   :  { %v750_v35 = vpack.c.bf16 %v711_v33, %v710_v32  ;;  %v1973_v36 = vpop.f32.mrb[52].mxu0 }
 0x14a   :  { %v624_v37 = vadd.f32 %v1973_v36, %v2316_v43  ;;  %v615_v38 = vpop.f32.mrb[53].mxu0 }
 0x14b   :  { %v616_v39 = vadd.f32 %v2316_v43, %v615_v38  ;;  %v1974_v40 = vpop.f32.mrb[54].mxu0  ;;  %2047 = vmatprep.mubr.bf16.mxu1 %v750_v35 }
 0x14c   :  { %v627_v41 = vadd.f32 %v1974_v40, %v2316_v43  ;;  %v618_v42 = vpop.f32.mrb[55].mxu0  ;;  %2048 = vmatmul.mubr.bf16.gmra.mrb[44].mxu1 %v751_v34  ;;  %v716_v45 = vmax.f32 %v624_v37, 0.0 }
 0x14d   :  { %v619_v44 = vadd.f32 %v2316_v43, %v618_v42  ;;  %v714_v47 = vmax.f32 %v616_v39, 0.0 }
 0x14e   :  { %v717_v46 = vmax.f32 %v627_v41, 0.0 }
 0x14f   :  { %v715_v48 = vmax.f32 %v619_v44, 0.0 }
 0x150   :  { %v753_v49 = vpack.c.bf16 %v717_v46, %v716_v45 }
 0x151   :  { %v752_v50 = vpack.c.bf16 %v715_v48, %v714_v47  ;;  %v1977_v51 = vpop.f32.mrb[56].mxu0 }
 0x152   :  { %v640_v52 = vadd.f32 %v1977_v51, %v2316_v43  ;;  %v631_v53 = vpop.f32.mrb[57].mxu0 }
 0x153   :  { %v632_v54 = vadd.f32 %v2316_v43, %v631_v53  ;;  %v1978_v55 = vpop.f32.mrb[58].mxu0  ;;  %2051 = vmatprep.mubr.bf16.mxu1 %v752_v50 }
 0x154   :  { %v643_v56 = vadd.f32 %v1978_v55, %v2316_v43  ;;  %v634_v57 = vpop.f32.mrb[59].mxu0  ;;  %2052 = vmatmul.mubr.bf16.gmra.mrb[48].mxu1 %v753_v49  ;;  %v720_v59 = vmax.f32 %v640_v52, 0.0 }
 0x155   :  { %v635_v58 = vadd.f32 %v2316_v43, %v634_v57  ;;  %v718_v61 = vmax.f32 %v632_v54, 0.0 }
 0x156   :  { %v721_v60 = vmax.f32 %v643_v56, 0.0 }
 0x157   :  { %v719_v62 = vmax.f32 %v635_v58, 0.0 }
 0x158   :  { %v755_v63 = vpack.c.bf16 %v721_v60, %v720_v59 }
 0x159   :  { %v754_v0 = vpack.c.bf16 %v719_v62, %v718_v61  ;;  %v1981_v1 = vpop.f32.mrb[60].mxu0 }
 0x15a   :  { %v656_v2 = vadd.f32 %v1981_v1, %v2316_v43  ;;  %v647_v3 = vpop.f32.mrb[61].mxu0 }
 0x15b   :  { %v648_v4 = vadd.f32 %v2316_v43, %v647_v3  ;;  %v1982_v5 = vpop.f32.mrb[62].mxu0  ;;  %2055 = vmatprep.mubr.bf16.mxu1 %v754_v0 }
 0x15c   :  { %v659_v6 = vadd.f32 %v1982_v5, %v2316_v43  ;;  %v650_v7 = vpop.f32.mrb[63].mxu0  ;;  %2056 = vmatmul.mubr.bf16.gmra.mrb[52].mxu1 %v755_v63  ;;  %v724_v9 = vmax.f32 %v656_v2, 0.0 }
 0x15d   :  { %v651_v8 = vadd.f32 %v2316_v43, %v650_v7  ;;  %v722_v11 = vmax.f32 %v648_v4, 0.0 }
 0x15e   :  { %v725_v10 = vmax.f32 %v659_v6, 0.0 }
 0x15f   :  { %v723_v12 = vmax.f32 %v651_v8, 0.0 }
 0x160   :  { %v757_v13 = vpack.c.bf16 %v725_v10, %v724_v9 }
 0x161   :  { %v756_v14 = vpack.c.bf16 %v723_v12, %v722_v11 }
 0x163   :  { %2059 = vmatprep.mubr.bf16.mxu1 %v756_v14 }
 0x164   :  { %2060 = vmatmul.mubr.bf16.gmra.mrb[56].mxu1 %v757_v13 }
 0x1bf   :  { %v2001_v15 = vpop.f32.mrb[64].mxu0 }
 0x1c0   :  { %v863_v17 = vpop.f32.mrb[65].mxu0  ;;  %v872_v19 = vadd.f32 %v2001_v15, %v2385_v16 }
 0x1c1   :  { %v2002_v18 = vpop.f32.mrb[66].mxu0  ;;  %v864_v21 = vadd.f32 %v2385_v16, %v863_v17 }
 0x1c2   :  { %v875_v43 = vadd.f32 %v2002_v18, %v2385_v16  ;;  %v866_v20 = vpop.f32.mrb[67].mxu0 }
 0x1c3   :  { %v867_v22 = vadd.f32 %v2385_v16, %v866_v20 }
 0x1c4   :  { %v1655_v23 = vpack.c.bf16 %v875_v43, %v872_v19 }
 0x1c5   :  { %v1650_v24 = vpack.c.bf16 %v867_v22, %v864_v21 }
 0x1c6   :  { %1807 = vst [vmem:[%s2552_s5 + $0x8] sm:$0xff] %v1655_v23  }
 0x1c7   :  { %1651 = vst [vmem:[%s2552_s5] sm:$0xff] %v1650_v24   ;;  %v2005_v25 = vpop.f32.mrb[0].mxu1 }
 0x1c8   :  { %v879_v26 = vpop.f32.mrb[1].mxu1  ;;  %v888_v28 = vadd.f32 %v2005_v25, %v2385_v16 }
 0x1c9   :  { %v2006_v27 = vpop.f32.mrb[2].mxu1  ;;  %v880_v31 = vadd.f32 %v2385_v16, %v879_v26 }
 0x1ca   :  { %v891_v29 = vadd.f32 %v2006_v27, %v2385_v16  ;;  %v882_v30 = vpop.f32.mrb[3].mxu1 }
 0x1cb   :  { %v883_v32 = vadd.f32 %v2385_v16, %v882_v30 }
 0x1cc   :  { %v1665_v33 = vpack.c.bf16 %v891_v29, %v888_v28 }
 0x1cd   :  { %v1660_v34 = vpack.c.bf16 %v883_v32, %v880_v31 }
 0x1ce   :  { %1809 = vst [vmem:[%s2552_s5 + $0x18] sm:$0xff] %v1665_v33  }
 0x1cf   :  { %1808 = vst [vmem:[%s2552_s5 + $0x10] sm:$0xff] %v1660_v34   ;;  %v2009_v35 = vpop.f32.mrb[4].mxu1 }
 0x1d0   :  { %v895_v36 = vpop.f32.mrb[5].mxu1  ;;  %v904_v38 = vadd.f32 %v2009_v35, %v2385_v16 }
 0x1d1   :  { %v2010_v37 = vpop.f32.mrb[6].mxu1  ;;  %v896_v41 = vadd.f32 %v2385_v16, %v895_v36 }
 0x1d2   :  { %v907_v39 = vadd.f32 %v2010_v37, %v2385_v16  ;;  %v898_v40 = vpop.f32.mrb[7].mxu1 }
 0x1d3   :  { %v899_v42 = vadd.f32 %v2385_v16, %v898_v40 }
 0x1d4   :  { %v1675_v44 = vpack.c.bf16 %v907_v39, %v904_v38 }
 0x1d5   :  { %v1670_v45 = vpack.c.bf16 %v899_v42, %v896_v41 }
 0x1d6   :  { %1811 = vst [vmem:[%s2552_s5 + $0x28] sm:$0xff] %v1675_v44  }
 0x1d7   :  { %1810 = vst [vmem:[%s2552_s5 + $0x20] sm:$0xff] %v1670_v45   ;;  %v2013_v46 = vpop.f32.mrb[8].mxu1 }
 0x1d8   :  { %v911_v47 = vpop.f32.mrb[9].mxu1  ;;  %v920_v49 = vadd.f32 %v2013_v46, %v2385_v16 }
 0x1d9   :  { %v2014_v48 = vpop.f32.mrb[10].mxu1  ;;  %v912_v52 = vadd.f32 %v2385_v16, %v911_v47 }
 0x1da   :  { %v923_v50 = vadd.f32 %v2014_v48, %v2385_v16  ;;  %v914_v51 = vpop.f32.mrb[11].mxu1 }
 0x1db   :  { %v915_v53 = vadd.f32 %v2385_v16, %v914_v51 }
 0x1dc   :  { %v1685_v54 = vpack.c.bf16 %v923_v50, %v920_v49 }
 0x1dd   :  { %v1680_v55 = vpack.c.bf16 %v915_v53, %v912_v52 }
 0x1de   :  { %1813 = vst [vmem:[%s2552_s5 + $0x38] sm:$0xff] %v1685_v54  }
 0x1df   :  { %1812 = vst [vmem:[%s2552_s5 + $0x30] sm:$0xff] %v1680_v55   ;;  %v2017_v56 = vpop.f32.mrb[12].mxu1 }
 0x1e0   :  { %v927_v57 = vpop.f32.mrb[13].mxu1  ;;  %v936_v59 = vadd.f32 %v2017_v56, %v2385_v16 }
 0x1e1   :  { %v2018_v58 = vpop.f32.mrb[14].mxu1  ;;  %v928_v62 = vadd.f32 %v2385_v16, %v927_v57 }
 0x1e2   :  { %v939_v60 = vadd.f32 %v2018_v58, %v2385_v16  ;;  %v930_v61 = vpop.f32.mrb[15].mxu1 }
 0x1e3   :  { %v931_v63 = vadd.f32 %v2385_v16, %v930_v61 }
 0x1e4   :  { %v1695_v0 = vpack.c.bf16 %v939_v60, %v936_v59 }
 0x1e5   :  { %v1690_v1 = vpack.c.bf16 %v931_v63, %v928_v62 }
 0x1e6   :  { %1815 = vst [vmem:[%s2552_s5 + $0x48] sm:$0xff] %v1695_v0  }
 0x1e7   :  { %1814 = vst [vmem:[%s2552_s5 + $0x40] sm:$0xff] %v1690_v1   ;;  %v2021_v2 = vpop.f32.mrb[16].mxu1 }
 0x1e8   :  { %v943_v3 = vpop.f32.mrb[17].mxu1  ;;  %v952_v5 = vadd.f32 %v2021_v2, %v2385_v16 }
 0x1e9   :  { %v2022_v4 = vpop.f32.mrb[18].mxu1  ;;  %v944_v8 = vadd.f32 %v2385_v16, %v943_v3 }
 0x1ea   :  { %v955_v6 = vadd.f32 %v2022_v4, %v2385_v16  ;;  %v946_v7 = vpop.f32.mrb[19].mxu1 }
 0x1eb   :  { %v947_v9 = vadd.f32 %v2385_v16, %v946_v7 }
 0x1ec   :  { %v1705_v10 = vpack.c.bf16 %v955_v6, %v952_v5 }
 0x1ed   :  { %v1700_v11 = vpack.c.bf16 %v947_v9, %v944_v8 }
 0x1ee   :  { %1817 = vst [vmem:[%s2552_s5 + $0x58] sm:$0xff] %v1705_v10  }
 0x1ef   :  { %1816 = vst [vmem:[%s2552_s5 + $0x50] sm:$0xff] %v1700_v11   ;;  %v2025_v12 = vpop.f32.mrb[20].mxu1 }
 0x1f0   :  { %v959_v13 = vpop.f32.mrb[21].mxu1  ;;  %v968_v15 = vadd.f32 %v2025_v12, %v2385_v16 }
 0x1f1   :  { %v2026_v14 = vpop.f32.mrb[22].mxu1  ;;  %v960_v19 = vadd.f32 %v2385_v16, %v959_v13 }
 0x1f2   :  { %v971_v17 = vadd.f32 %v2026_v14, %v2385_v16  ;;  %v962_v18 = vpop.f32.mrb[23].mxu1 }
 0x1f3   :  { %v963_v43 = vadd.f32 %v2385_v16, %v962_v18 }
 0x1f4   :  { %v1715_v20 = vpack.c.bf16 %v971_v17, %v968_v15 }
 0x1f5   :  { %v1710_v21 = vpack.c.bf16 %v963_v43, %v960_v19 }
 0x1f6   :  { %1819 = vst [vmem:[%s2552_s5 + $0x68] sm:$0xff] %v1715_v20  }
 0x1f7   :  { %1818 = vst [vmem:[%s2552_s5 + $0x60] sm:$0xff] %v1710_v21   ;;  %v2029_v22 = vpop.f32.mrb[24].mxu1 }
 0x1f8   :  { %v975_v23 = vpop.f32.mrb[25].mxu1  ;;  %v984_v25 = vadd.f32 %v2029_v22, %v2385_v16 }
 0x1f9   :  { %v2030_v24 = vpop.f32.mrb[26].mxu1  ;;  %v976_v28 = vadd.f32 %v2385_v16, %v975_v23 }
 0x1fa   :  { %v987_v26 = vadd.f32 %v2030_v24, %v2385_v16  ;;  %v978_v27 = vpop.f32.mrb[27].mxu1 }
 0x1fb   :  { %v979_v29 = vadd.f32 %v2385_v16, %v978_v27 }
 0x1fc   :  { %v1725_v30 = vpack.c.bf16 %v987_v26, %v984_v25 }
 0x1fd   :  { %v1720_v31 = vpack.c.bf16 %v979_v29, %v976_v28 }
 0x1fe   :  { %1821 = vst [vmem:[%s2552_s5 + $0x78] sm:$0xff] %v1725_v30  }
 0x1ff   :  { %1820 = vst [vmem:[%s2552_s5 + $0x70] sm:$0xff] %v1720_v31   ;;  %v2033_v32 = vpop.f32.mrb[28].mxu1 }
 0x200   :  { %v991_v33 = vpop.f32.mrb[29].mxu1  ;;  %v1000_v35 = vadd.f32 %v2033_v32, %v2385_v16 }
 0x201   :  { %v2034_v34 = vpop.f32.mrb[30].mxu1  ;;  %v992_v38 = vadd.f32 %v2385_v16, %v991_v33 }
 0x202   :  { %v1003_v36 = vadd.f32 %v2034_v34, %v2385_v16  ;;  %v994_v37 = vpop.f32.mrb[31].mxu1 }
 0x203   :  { %v995_v39 = vadd.f32 %v2385_v16, %v994_v37 }
 0x204   :  { %v1735_v40 = vpack.c.bf16 %v1003_v36, %v1000_v35 }
 0x205   :  { %v1730_v41 = vpack.c.bf16 %v995_v39, %v992_v38 }
 0x206   :  { %1823 = vst [vmem:[%s2552_s5 + $0x88] sm:$0xff] %v1735_v40  }
 0x207   :  { %1822 = vst [vmem:[%s2552_s5 + $0x80] sm:$0xff] %v1730_v41   ;;  %v2037_v42 = vpop.f32.mrb[32].mxu1 }
 0x208   :  { %v1007_v44 = vpop.f32.mrb[33].mxu1  ;;  %v1016_v46 = vadd.f32 %v2037_v42, %v2385_v16 }
 0x209   :  { %v2038_v45 = vpop.f32.mrb[34].mxu1  ;;  %v1008_v49 = vadd.f32 %v2385_v16, %v1007_v44 }
 0x20a   :  { %v1019_v47 = vadd.f32 %v2038_v45, %v2385_v16  ;;  %v1010_v48 = vpop.f32.mrb[35].mxu1 }
 0x20b   :  { %v1011_v50 = vadd.f32 %v2385_v16, %v1010_v48 }
 0x20c   :  { %v1745_v51 = vpack.c.bf16 %v1019_v47, %v1016_v46 }
 0x20d   :  { %v1740_v52 = vpack.c.bf16 %v1011_v50, %v1008_v49 }
 0x20e   :  { %1825 = vst [vmem:[%s2552_s5 + $0x98] sm:$0xff] %v1745_v51  }
 0x20f   :  { %1824 = vst [vmem:[%s2552_s5 + $0x90] sm:$0xff] %v1740_v52   ;;  %v2041_v53 = vpop.f32.mrb[36].mxu1 }
 0x210   :  { %v1023_v54 = vpop.f32.mrb[37].mxu1  ;;  %v1032_v56 = vadd.f32 %v2041_v53, %v2385_v16 }
 0x211   :  { %v2042_v55 = vpop.f32.mrb[38].mxu1  ;;  %v1024_v59 = vadd.f32 %v2385_v16, %v1023_v54 }
 0x212   :  { %v1035_v57 = vadd.f32 %v2042_v55, %v2385_v16  ;;  %v1026_v58 = vpop.f32.mrb[39].mxu1 }
 0x213   :  { %v1027_v60 = vadd.f32 %v2385_v16, %v1026_v58 }
 0x214   :  { %v1755_v61 = vpack.c.bf16 %v1035_v57, %v1032_v56 }
 0x215   :  { %v1750_v62 = vpack.c.bf16 %v1027_v60, %v1024_v59 }
 0x216   :  { %1827 = vst [vmem:[%s2552_s5 + $0xa8] sm:$0xff] %v1755_v61  }
 0x217   :  { %1826 = vst [vmem:[%s2552_s5 + $0xa0] sm:$0xff] %v1750_v62   ;;  %v2045_v63 = vpop.f32.mrb[40].mxu1 }
 0x218   :  { %v1039_v0 = vpop.f32.mrb[41].mxu1  ;;  %v1048_v2 = vadd.f32 %v2045_v63, %v2385_v16 }
 0x219   :  { %v2046_v1 = vpop.f32.mrb[42].mxu1  ;;  %v1040_v5 = vadd.f32 %v2385_v16, %v1039_v0 }
 0x21a   :  { %v1051_v3 = vadd.f32 %v2046_v1, %v2385_v16  ;;  %v1042_v4 = vpop.f32.mrb[43].mxu1 }
 0x21b   :  { %v1043_v6 = vadd.f32 %v2385_v16, %v1042_v4 }
 0x21c   :  { %v1765_v7 = vpack.c.bf16 %v1051_v3, %v1048_v2 }
 0x21d   :  { %v1760_v8 = vpack.c.bf16 %v1043_v6, %v1040_v5 }
 0x21e   :  { %1829 = vst [vmem:[%s2552_s5 + $0xb8] sm:$0xff] %v1765_v7  }
 0x21f   :  { %1828 = vst [vmem:[%s2552_s5 + $0xb0] sm:$0xff] %v1760_v8   ;;  %v2049_v9 = vpop.f32.mrb[44].mxu1 }
 0x220   :  { %v1055_v10 = vpop.f32.mrb[45].mxu1  ;;  %v1064_v12 = vadd.f32 %v2049_v9, %v2385_v16 }
 0x221   :  { %v2050_v11 = vpop.f32.mrb[46].mxu1  ;;  %v1056_v15 = vadd.f32 %v2385_v16, %v1055_v10 }
 0x222   :  { %v1067_v13 = vadd.f32 %v2050_v11, %v2385_v16  ;;  %v1058_v14 = vpop.f32.mrb[47].mxu1 }
 0x223   :  { %v1059_v17 = vadd.f32 %v2385_v16, %v1058_v14 }
 0x224   :  { %v1775_v18 = vpack.c.bf16 %v1067_v13, %v1064_v12 }
 0x225   :  { %v1770_v19 = vpack.c.bf16 %v1059_v17, %v1056_v15 }
 0x226   :  { %1831 = vst [vmem:[%s2552_s5 + $0xc8] sm:$0xff] %v1775_v18  }
 0x227   :  { %1830 = vst [vmem:[%s2552_s5 + $0xc0] sm:$0xff] %v1770_v19   ;;  %v2053_v43 = vpop.f32.mrb[48].mxu1 }
 0x228   :  { %v1071_v20 = vpop.f32.mrb[49].mxu1  ;;  %v1080_v22 = vadd.f32 %v2053_v43, %v2385_v16 }
 0x229   :  { %v2054_v21 = vpop.f32.mrb[50].mxu1  ;;  %v1072_v25 = vadd.f32 %v2385_v16, %v1071_v20 }
 0x22a   :  { %v1083_v23 = vadd.f32 %v2054_v21, %v2385_v16  ;;  %v1074_v24 = vpop.f32.mrb[51].mxu1 }
 0x22b   :  { %v1075_v26 = vadd.f32 %v2385_v16, %v1074_v24 }
 0x22c   :  { %v1785_v27 = vpack.c.bf16 %v1083_v23, %v1080_v22 }
 0x22d   :  { %v1780_v28 = vpack.c.bf16 %v1075_v26, %v1072_v25 }
 0x22e   :  { %1833 = vst [vmem:[%s2552_s5 + $0xd8] sm:$0xff] %v1785_v27  }
 0x22f   :  { %1832 = vst [vmem:[%s2552_s5 + $0xd0] sm:$0xff] %v1780_v28   ;;  %v2057_v29 = vpop.f32.mrb[52].mxu1 }
 0x230   :  { %v1087_v30 = vpop.f32.mrb[53].mxu1  ;;  %v1096_v32 = vadd.f32 %v2057_v29, %v2385_v16 }
 0x231   :  { %v2058_v31 = vpop.f32.mrb[54].mxu1  ;;  %v1088_v35 = vadd.f32 %v2385_v16, %v1087_v30 }
 0x232   :  { %v1099_v33 = vadd.f32 %v2058_v31, %v2385_v16  ;;  %v1090_v34 = vpop.f32.mrb[55].mxu1 }
 0x233   :  { %v1091_v36 = vadd.f32 %v2385_v16, %v1090_v34 }
 0x234   :  { %v1795_v37 = vpack.c.bf16 %v1099_v33, %v1096_v32 }
 0x235   :  { %v1790_v38 = vpack.c.bf16 %v1091_v36, %v1088_v35 }
 0x236   :  { %1835 = vst [vmem:[%s2552_s5 + $0xe8] sm:$0xff] %v1795_v37  }
 0x237   :  { %1834 = vst [vmem:[%s2552_s5 + $0xe0] sm:$0xff] %v1790_v38   ;;  %v2061_v39 = vpop.f32.mrb[56].mxu1 }
 0x238   :  { %v1103_v40 = vpop.f32.mrb[57].mxu1  ;;  %v1112_v42 = vadd.f32 %v2061_v39, %v2385_v16 }
 0x239   :  { %v2062_v41 = vpop.f32.mrb[58].mxu1  ;;  %v1104_v46 = vadd.f32 %v2385_v16, %v1103_v40 }
 0x23a   :  { %v1115_v44 = vadd.f32 %v2062_v41, %v2385_v16  ;;  %v1106_v45 = vpop.f32.mrb[59].mxu1 }
 0x23b   :  { %v1107_v47 = vadd.f32 %v2385_v16, %v1106_v45 }
 0x23c   :  { %v1805_v48 = vpack.c.bf16 %v1115_v44, %v1112_v42 }
 0x23d   :  { %v1800_v49 = vpack.c.bf16 %v1107_v47, %v1104_v46 }
 0x23e   :  { %1837 = vst [vmem:[%s2552_s5 + $0xf8] sm:$0xff] %v1805_v48  }
 0x23f   :  { %1836 = vst [vmem:[%s2552_s5 + $0xf0] sm:$0xff] %v1800_v49  }

</bundles_post_ra>
